<compile_context>
chip_gen: v7x
topology: tpu7x:2x2x1
jax: 0.10.0
libtpu: 0.0.40
codegen_flags: <defaults>
</compile_context>

<pallas_src>
import numpy as np
import jax
import jax.numpy as jnp
from jax.experimental import pallas as pl
from jax.experimental.pallas import tpu as pltpu

LANE = 128
MIN_ROW_TILE = 16          # bf16 vregs pack 16 sublanes
PREF_LANE_TILE = 512       # preferred lane tile for streamed weight axes


# ----------------------------------------------------------------------------
# helpers
# ----------------------------------------------------------------------------
def _round_up(x, m):
    return ((x + m - 1) // m) * m


def _next_pow2(x):
    x = int(x)
    return 1 if x <= 1 else 1 << (x - 1).bit_length()


def _pick_tile_and_pad(width, pref=PREF_LANE_TILE):
    """Pad `width` so that a large lane tile (multiple of 128, <= pref) divides it."""
    w = _round_up(max(int(width), 1), LANE)
    tile = min(pref, w)
    return _round_up(w, tile), tile


def _bucket_rows(m):
    """Bucket a row count to bound compiled shapes. Returns (m_pad, row_tile)."""
    m = int(m)
    if m <= MIN_ROW_TILE:
        return MIN_ROW_TILE, MIN_ROW_TILE
    if m <= 128:
        p = _next_pow2(m)
        return p, p
    return _round_up(m, 128), 128


def _pad_2d(a, rows, cols, dtype):
    out = jnp.zeros((rows, cols), dtype=dtype)
    return out.at[: a.shape[0], : a.shape[1]].set(a.astype(dtype))


def _default_vmem_limit():
    """Per-generation VMEM limit: ~3/4 of physical VMEM, capped at 96 MiB."""
    cap = 64 * 1024 * 1024
    try:
        info = pltpu.get_tpu_info()
        cap = int(getattr(info, "vmem_capacity_bytes", cap)) or cap
    except Exception:
        pass
    return max(32 * 1024 * 1024, min((cap * 3) // 4, 96 * 1024 * 1024))


def _fullk_blocks_fit(m_tile, k_pad, n_tile, budget):
    need = (2 * m_tile * k_pad * 2      # x bf16, double-buffered
            + 2 * k_pad * n_tile * 2    # w bf16, double-buffered
            + 2 * n_tile * 4            # bias f32, double-buffered
            + 2 * m_tile * n_tile * 4)  # out f32, double-buffered
    return need <= budget


def _fused_tail_fits(m_tile, d_pad, h_pad, v_tile, budget):
    need = (2 * m_tile * d_pad * 2      # x bf16, double-buffered
            + 1 * d_pad * h_pad * 2     # w1 bf16, single-buffered (Buffered(1))
            + 2 * h_pad * v_tile * 2    # w2 bf16, double-buffered
            + 2 * m_tile * v_tile * 4   # out f32, double-buffered
            + m_tile * h_pad * 2)       # h scratch bf16
    return need <= budget


# ----------------------------------------------------------------------------
# Pallas kernels
# ----------------------------------------------------------------------------
def _mm_bias_kernel(x_ref, w_ref, b_ref, o_ref):
    # Single full-K matmul: o = x @ w + b (bf16 operands, f32 accumulation).
    o_ref[...] = (jnp.dot(x_ref[...], w_ref[...],
                          preferred_element_type=jnp.float32)
                  + b_ref[...]).astype(o_ref.dtype)


def _mm_bias_acc_kernel(x_ref, w_ref, b_ref, o_ref):
    # K-tiled matmul accumulating directly into the resident f32 output block
    # (no acc scratch); initialized with the broadcast bias at k == 0.
    @pl.when(pl.program_id(2) == 0)
    def _():
        o_ref[...] = jnp.broadcast_to(b_ref[...], o_ref.shape).astype(o_ref.dtype)

    o_ref[...] += jnp.dot(x_ref[...], w_ref[...],
                          preferred_element_type=jnp.float32)


def _tail_fused_kernel(x_ref, w1_ref, w2_ref, o_ref, h_ref):
    # h = x @ w1 computed once per row tile (v == 0), cached in a *bf16* VMEM
    # scratch; o = h @ w2 streamed over the padded vocab axis.
    # NOTE: the V axis MUST stay "arbitrary" -- if it were megacore-sharded the
    # pl.when(v == 0) initialization would not run on the second core's chunk.
    v = pl.program_id(1)

    @pl.when(v == 0)
    def _():
        h_ref[...] = jnp.dot(x_ref[...], w1_ref[...],
                             preferred_element_type=jnp.float32).astype(h_ref.dtype)

    o_ref[...] = jnp.dot(h_ref[...], w2_ref[...],
                         preferred_element_type=jnp.float32).astype(o_ref.dtype)


# ----------------------------------------------------------------------------
# pallas_call builders (cached per static shape by the model class)
# ----------------------------------------------------------------------------
def _build_matmul_call(m_pad, k_pad, n_pad, tm, tn, tk, vmem_limit):
    """o[m,n] = x[m,k] @ w[k,n] + b[1,n].  tk=None -> no reduction grid axis."""
    flops = 2 * m_pad * k_pad * n_pad
    bytes_accessed = (m_pad * k_pad * 2 + k_pad * n_pad * 2
                      + n_pad * 4 + m_pad * n_pad * 4)
    if tk is None or tk >= k_pad:
        grid = (m_pad // tm, n_pad // tn)
        kernel = _mm_bias_kernel
        in_specs = [
            pl.BlockSpec((tm, k_pad), lambda i, j: (i, 0)),
            pl.BlockSpec((k_pad, tn), lambda i, j: (0, j)),
            pl.BlockSpec((1, tn), lambda i, j: (0, j)),
        ]
        out_specs = pl.BlockSpec((tm, tn), lambda i, j: (i, j))
        semantics = ("parallel", "parallel")
    else:
        grid = (m_pad // tm, n_pad // tn, k_pad // tk)
        kernel = _mm_bias_acc_kernel
        in_specs = [
            pl.BlockSpec((tm, tk), lambda i, j, k: (i, k)),
            pl.BlockSpec((tk, tn), lambda i, j, k: (k, j)),
            pl.BlockSpec((1, tn), lambda i, j, k: (0, j)),
        ]
        out_specs = pl.BlockSpec((tm, tn), lambda i, j, k: (i, j))
        semantics = ("parallel", "parallel", "arbitrary")
    return jax.jit(pl.pallas_call(
        kernel,
        out_shape=jax.ShapeDtypeStruct((m_pad, n_pad), jnp.float32),
        grid_spec=pltpu.PrefetchScalarGridSpec(
            num_scalar_prefetch=0, grid=grid,
            in_specs=in_specs, out_specs=out_specs),
        compiler_params=pltpu.CompilerParams(
            dimension_semantics=semantics, vmem_limit_bytes=vmem_limit),
        cost_estimate=pl.CostEstimate(
            flops=flops, transcendentals=0, bytes_accessed=bytes_accessed),
    ))


def _build_tail_fused_call(m_pad, d_pad, h_pad, v_pad, tm, tv, vmem_limit):
    grid = (m_pad // tm, v_pad // tv)
    flops = 2 * m_pad * d_pad * h_pad + 2 * m_pad * h_pad * v_pad
    bytes_accessed = (m_pad * d_pad * 2 + d_pad * h_pad * 2
                      + h_pad * v_pad * 2 + m_pad * v_pad * 4)
    return jax.jit(pl.pallas_call(
        _tail_fused_kernel,
        out_shape=jax.ShapeDtypeStruct((m_pad, v_pad), jnp.float32),
        grid_spec=pltpu.PrefetchScalarGridSpec(
            num_scalar_prefetch=0, grid=grid,
            in_specs=[
                pl.BlockSpec((tm, d_pad), lambda i, j: (i, 0)),
                # w1's block index is grid-invariant: single-buffer it so the
                # dominant VMEM consumer is not duplicated by the pipeline.
                pl.BlockSpec((d_pad, h_pad), lambda i, j: (0, 0),
                             pipeline_mode=pl.Buffered(1)),
                # w2 stream: default double-buffering (bandwidth-bound here).
                pl.BlockSpec((h_pad, tv), lambda i, j: (0, j)),
            ],
            out_specs=pl.BlockSpec((tm, tv), lambda i, j: (i, j)),
            scratch_shapes=[pltpu.VMEM((tm, h_pad), jnp.bfloat16)],
        ),
        compiler_params=pltpu.CompilerParams(
            # V must stay "arbitrary": h scratch is initialized at v == 0.
            dimension_semantics=("parallel", "arbitrary"),
            vmem_limit_bytes=vmem_limit),
        cost_estimate=pl.CostEstimate(
            flops=flops, transcendentals=0, bytes_accessed=bytes_accessed),
    ))


# ----------------------------------------------------------------------------
# AdaptiveSoftmax (forward only) on top of the Pallas kernels
# ----------------------------------------------------------------------------
class AdaptiveSoftmaxPallas:
    def __init__(self, input_size, cutoff, key):
        self.input_size = input_size
        self.cutoff = list(cutoff)
        self.output_size = cutoff[0] + len(cutoff) - 1
        self.n_clusters = len(cutoff) - 1

        keys = jax.random.split(key, 2 + 2 * self.n_clusters)
        std = 1.0 / np.sqrt(input_size)
        # head: Linear(input_size, output_size) with bias (PyTorch layout kept)
        self.head_w = jax.random.uniform(
            keys[0], (self.output_size, input_size), jnp.float32, -std, std)
        self.head_b = jax.random.uniform(
            keys[1], (self.output_size,), jnp.float32, -std, std)

        # tails: Sequential(Linear(D, D//4**i, bias=False),
        #                   Linear(D//4**i, cutoff[i+1]-cutoff[i], bias=False))
        self.tail_params = []
        for i in range(self.n_clusters):
            hid = input_size // 4 ** i
            vsz = cutoff[i + 1] - cutoff[i]
            w1 = jax.random.uniform(
                keys[2 + 2 * i], (hid, input_size), jnp.float32, -std, std)
            w2 = jax.random.uniform(
                keys[3 + 2 * i], (vsz, hid), jnp.float32,
                -1.0 / np.sqrt(hid), 1.0 / np.sqrt(hid))
            self.tail_params.append((w1, w2))

        # --- device-ready weights: transposed, zero-padded, bf16 + tiling plan ---
        self.vmem_limit = _default_vmem_limit()
        budget = (self.vmem_limit * 3) // 4

        self.d_pad = _round_up(input_size, LANE)
        self.o_pad, self.tn_head = _pick_tile_and_pad(self.output_size)

        # Full-K head when the K-resident blocks fit (typical adaptive-softmax
        # D easily does); otherwise K-tiled grid with direct o_ref accumulation.
        self.head_tk = None
        if not _fullk_blocks_fit(128, self.d_pad, self.tn_head, budget):
            self.head_tk = PREF_LANE_TILE
            self.d_pad = _round_up(self.d_pad, self.head_tk)

        self.head_wt = _pad_2d(self.head_w.T, self.d_pad, self.o_pad, jnp.bfloat16)
        self.head_bp = _pad_2d(self.head_b.reshape(1, -1), 1, self.o_pad, jnp.float32)

        self.tail_cached = []
        for i in range(self.n_clusters):
            w1, w2 = self.tail_params[i]
            hid, vsz = int(w1.shape[0]), int(w2.shape[0])
            h_pad, th = _pick_tile_and_pad(hid)
            v_pad, tv = _pick_tile_and_pad(vsz)
            fused = _fused_tail_fits(128, self.d_pad, h_pad, tv, budget)
            tk2 = None
            if not fused:
                # Split path for very large D/H: h = x@w1 as its own
                # row-parallel call, then o = h@w2 with a fully parallel grid
                # (also lets the vocab axis be megacore-sharded on v7x).
                if not _fullk_blocks_fit(128, h_pad, tv, budget):
                    tk2 = PREF_LANE_TILE
                    h_pad = _round_up(h_pad, tk2)
                    th = PREF_LANE_TILE
            entry = dict(
                w1t=_pad_2d(w1.T, self.d_pad, h_pad, jnp.bfloat16),
                w2t=_pad_2d(w2.T, h_pad, v_pad, jnp.bfloat16),
                h_pad=h_pad, v_pad=v_pad, tv=tv, th=th, tk2=tk2,
                vsz=vsz, fused=fused)
            if not fused:
                entry["zb_h"] = jnp.zeros((1, h_pad), jnp.float32)
                entry["zb_v"] = jnp.zeros((1, v_pad), jnp.float32)
            self.tail_cached.append(entry)

        self._mm_fns = {}
        self._tail_fns = {}
        self.id = None

    # -- data-dependent bookkeeping (host-side glue, mirrors the PyTorch module) --
    def set_target(self, target):
        target = np.asarray(target)
        self.id = []
        for i in range(self.n_clusters):
            mask = (target >= self.cutoff[i]) & (target < self.cutoff[i + 1])
            if mask.sum() > 0:
                self.id.append(np.nonzero(mask)[0].astype(np.int32))
            else:
                self.id.append(None)

    # -- cached kernel builders --
    def _get_mm_fn(self, m_pad, k_pad, n_pad, tm, tn, tk):
        key = (m_pad, k_pad, n_pad, tm, tn, tk)
        if key not in self._mm_fns:
            self._mm_fns[key] = _build_matmul_call(
                m_pad, k_pad, n_pad, tm, tn, tk, self.vmem_limit)
        return self._mm_fns[key]

    def _get_tail_fn(self, m_pad, h_pad, v_pad, tm, tv):
        key = (m_pad, h_pad, v_pad, tm, tv)
        if key not in self._tail_fns:
            self._tail_fns[key] = _build_tail_fused_call(
                m_pad, self.d_pad, h_pad, v_pad, tm, tv, self.vmem_limit)
        return self._tail_fns[key]

    # -- forward --
    def forward(self, x):
        if self.id is None:
            raise RuntimeError("set_target(target) must be called before forward()")
        n, d = x.shape
        assert d == self.input_size

        n_pad, tm = _bucket_rows(n)
        # pad rows/lanes + cast to bf16 once; shared by the head and all tail gathers
        x_pad = jnp.zeros((n_pad, self.d_pad), jnp.bfloat16)
        x_pad = x_pad.at[:n, :d].set(x.astype(jnp.bfloat16))

        head_fn = self._get_mm_fn(n_pad, self.d_pad, self.o_pad, tm,
                                  self.tn_head, self.head_tk)
        head_out = head_fn(x_pad, self.head_wt, self.head_bp)[:n, : self.output_size]
        output = [head_out]

        for i in range(self.n_clusters):
            idx = self.id[i]
            if idx is None:
                output.append(None)
                continue
            m = int(idx.shape[0])
            m_pad, tm_t = _bucket_rows(m)
            # TODO(synk): replace this host-side gather + per-cluster launch with
            # scalar-prefetched row indices (num_scalar_prefetch=1) and a fused
            # multi-cluster tail pallas_call.
            idx_pad = np.zeros((m_pad,), np.int32)
            idx_pad[:m] = idx
            x_sel = jnp.take(x_pad, jnp.asarray(idx_pad), axis=0)  # index_select(0, id)

            t = self.tail_cached[i]
            if t["fused"]:
                fn = self._get_tail_fn(m_pad, t["h_pad"], t["v_pad"], tm_t, t["tv"])
                out = fn(x_sel, t["w1t"], t["w2t"])
            else:
                mm1 = self._get_mm_fn(m_pad, self.d_pad, t["h_pad"], tm_t,
                                      t["th"], self.head_tk)
                h = mm1(x_sel, t["w1t"], t["zb_h"]).astype(jnp.bfloat16)
                mm2 = self._get_mm_fn(m_pad, t["h_pad"], t["v_pad"], tm_t,
                                      t["tv"], t["tk2"])
                out = mm2(h, t["w2t"], t["zb_v"])
            output.append(out[:m, : t["vsz"]])
        return output


# ----------------------------------------------------------------------------
# Reference (plain JAX, emulating the bf16-operand / f32-accumulate math)
# ----------------------------------------------------------------------------
def forward_reference(model, x):
    xb = x.astype(jnp.bfloat16).astype(jnp.float32)
    hw = model.head_w.astype(jnp.bfloat16).astype(jnp.float32)
    out = [xb @ hw.T + model.head_b]
    for i in range(model.n_clusters):
        idx = model.id[i]
        if idx is None:
            out.append(None)
            continue
        xs = jnp.take(xb, jnp.asarray(idx), axis=0)
        w1 = model.tail_params[i][0].astype(jnp.bfloat16).astype(jnp.float32)
        w2 = model.tail_params[i][1].astype(jnp.bfloat16).astype(jnp.float32)
        h = xs @ w1.T
        h = h.astype(jnp.bfloat16).astype(jnp.float32)
        out.append(h @ w2.T)
    return out


if __name__ == "__main__":
    key = jax.random.PRNGKey(0)
    k_param, k_x, k_t = jax.random.split(key, 3)

    input_size = 32
    cutoff = [8, 16, 32]
    batch = 8

    model = AdaptiveSoftmaxPallas(input_size, cutoff, k_param)

    x = jax.random.normal(k_x, (batch, input_size), jnp.float32)
    target = np.asarray(jax.random.randint(k_t, (batch,), 0, cutoff[-1], jnp.int32))

    model.set_target(target)
    outs = model.forward(x)
    outs = [o if o is None else jax.block_until_ready(o) for o in outs]

    refs = forward_reference(model, x)
    for o, r in zip(outs, refs):
        if o is None:
            assert r is None
            continue
        np.testing.assert_allclose(np.asarray(o), np.asarray(r),
                                   rtol=2e-3, atol=2e-3)

    print("KERNEL_OK")
</pallas_src>

<mosaic_0001>
module attributes {stable_mosaic.version = 11 : i64} {
  func.func @_mm_bias_kernel(%arg0: i32, %arg1: i32, %arg2: memref<16x128xbf16, #tpu.memory_space<vmem>>, %arg3: memref<128x128xbf16, #tpu.memory_space<vmem>>, %arg4: memref<1x128xf32, #tpu.memory_space<vmem>>, %arg5: memref<16x128xf32, #tpu.memory_space<vmem>>) attributes {dimension_semantics = [#tpu.dimension_semantics<parallel>, #tpu.dimension_semantics<parallel>], iteration_bounds = array<i64: 1, 1>, scalar_prefetch = 0 : i64, scratch_operands = 0 : i64, tpu.core_type = #tpu.core_type<tc>, window_params = [{transform_indices = @transform_0, window_bounds = array<i64: 16, 128>}, {transform_indices = @transform_1, window_bounds = array<i64: 128, 128>}, {transform_indices = @transform_2, window_bounds = array<i64: 1, 128>}, {transform_indices = @transform_3, window_bounds = array<i64: 16, 128>}]} {
    %c0 = arith.constant 0 : index
    %c0_0 = arith.constant 0 : index
    %0 = vector.load %arg2[%c0, %c0_0] : memref<16x128xbf16, #tpu.memory_space<vmem>>, vector<16x128xbf16>
    %c0_1 = arith.constant 0 : index
    %c0_2 = arith.constant 0 : index
    %1 = vector.load %arg3[%c0_1, %c0_2] : memref<128x128xbf16, #tpu.memory_space<vmem>>, vector<128x128xbf16>
    %cst = arith.constant dense<0.000000e+00> : vector<16x128xf32>
    %2 = tpu.matmul %0, %1, %cst {dimension_numbers = #tpu.dot_dimension_numbers<[1], [0], [0], [1], [0, 0, 1, 1], [], []>} : vector<16x128xbf16>, vector<128x128xbf16>, vector<16x128xf32> -> vector<16x128xf32>
    %c0_3 = arith.constant 0 : index
    %c0_4 = arith.constant 0 : index
    %3 = vector.load %arg4[%c0_3, %c0_4] : memref<1x128xf32, #tpu.memory_space<vmem>>, vector<1x128xf32>
    %4 = vector.broadcast %3 : vector<1x128xf32> to vector<16x128xf32>
    %5 = arith.addf %2, %4 : vector<16x128xf32>
    %c0_5 = arith.constant 0 : index
    %c0_6 = arith.constant 0 : index
    %6 = vector.load %arg5[%c0_5, %c0_6] : memref<16x128xf32, #tpu.memory_space<vmem>>, vector<16x128xf32>
    tpu.vector_store %arg5[%c0_5, %c0_6], %5 {strides = array<i32>} : memref<16x128xf32, #tpu.memory_space<vmem>>, vector<16x128xf32>,
    return
  }
  func.func @transform_0(%arg0: i32, %arg1: i32) -> (i32, i32) {
    %c0_i32 = arith.constant 0 : i32
    %c0_i32_0 = arith.constant 0 : i32
    return %arg0, %c0_i32 : i32, i32
  }
  func.func @transform_1(%arg0: i32, %arg1: i32) -> (i32, i32) {
    %c0_i32 = arith.constant 0 : i32
    %c0_i32_0 = arith.constant 0 : i32
    return %c0_i32, %arg1 : i32, i32
  }
  func.func @transform_2(%arg0: i32, %arg1: i32) -> (i32, i32) {
    %c0_i32 = arith.constant 0 : i32
    %c0_i32_0 = arith.constant 0 : i32
    return %c0_i32, %arg1 : i32, i32
  }
  func.func @transform_3(%arg0: i32, %arg1: i32) -> (i32, i32) {
    %c0_i32 = arith.constant 0 : i32
    return %arg0, %arg1 : i32, i32
  }
}

</mosaic_0001>

<bundles_post_ra>
// kernel: tpu_custom_call.1
= control target key start
LH: loop header
LB: loop body
LE: loop exit
PB: predicated region body
PF: predicated region fallthrough
CT: control target
= control target key end

     0   :  { %8 = vsyncpa [#allocation3], 0  ;;  %s381_s0 = inlined_call_operand.hbm [shape: bf16[16,128], index: 0, kind: input, shape index: {}]   ;;  %s382_s1 = inlined_call_operand.hbm [shape: bf16[128,128], index: 1, kind: input, shape index: {}]   ;;  %s383_s2 = inlined_call_operand.vmem [shape: f32[1,128], index: 2, kind: input, shape index: {}]   ;;  %s384_s3 = inlined_call_operand.hbm [shape: f32[16,128], index: 3, kind: output, shape index: {}]  }
   0x1   :  { %9 = vsyncpa [#allocation6], 0 }
   0x2   :  { %10 = vsyncpa [#allocation4], 0  ;;  %s313_s12 = smov [#allocation2]   ;;  %s241_s16 = scalar_lea.hbm %s381_s0, 128 }
   0x3   :  { %s16_s13 = sshll.u32 %s313_s12, 4  ;;  %p242_p0 = scmp.ne.s32.totalorder %s381_s0, %s241_s16  ;;  %s17_s13 = int_to_ptr.vmem [resolvable:$true] %s16_s13 }
   0x4   :  { %p245_p1 = scmp.lt.u32.totalorder %s241_s16, %s381_s0 }
   0x6   :  { %p247_p2 = pnand %p245_p1, %p242_p0 }
   0x8   :  { %250 = shalt.err (!%p247_p2)
}
   0x9   :  { %s251_s21 = scalar_lea.vmem %s17_s13, 128  ;;  %p256_p4 = scmp.lt.s32.totalorder %s17_s13, %s17_s13 }
   0xa   :  { %p252_p3 = scmp.ne.s32.totalorder %s17_s13, %s251_s21  ;;  %p257_p5 = scmp.lt.s32.totalorder %s251_s21, %s251_s21 }
   0xc   :  { %p258_p6 = por %p257_p5, %p256_p4 }
   0xe   :  { %p259_p7 = pnand %p258_p6, %p252_p3 }
  0x10   :  { %262 = shalt.err (!%p259_p7)
}
  0x11   :  { %s314_s22 = smov 64   ;;  %s315_s23 = smov 4  }
  0x12   :  { %22 = dma.hbm_to_vmem [thread:$0]  %s381_s0, 128, %s17_s13, [#allocation3], %s314_s22, %s314_s22, %s315_s23  }
  0x13   :  { %s316_s26 = smov [#allocation5]   ;;  %s263_s30 = scalar_lea.hbm %s382_s1, 1024 }
  0x14   :  { %s28_s27 = sshll.u32 %s316_s26, 4  ;;  %p264_p8 = scmp.ne.s32.totalorder %s382_s1, %s263_s30  ;;  %s29_s27 = int_to_ptr.vmem [resolvable:$true] %s28_s27 }
  0x15   :  { %p267_p9 = scmp.lt.u32.totalorder %s263_s30, %s382_s1 }
  0x17   :  { %p269_p10 = pnand %p267_p9, %p264_p8 }
  0x19   :  { %272 = shalt.err (!%p269_p10)
}
  0x1a   :  { %s273_s8 = scalar_lea.vmem %s29_s27, 1024  ;;  %p278_p12 = scmp.lt.s32.totalorder %s29_s27, %s29_s27 }
  0x1b   :  { %p274_p11 = scmp.ne.s32.totalorder %s29_s27, %s273_s8  ;;  %p279_p13 = scmp.lt.s32.totalorder %s273_s8, %s273_s8 }
  0x1d   :  { %p280_p0 = por %p279_p13, %p278_p12 }
  0x1f   :  { %p281_p1 = pnand %p280_p0, %p274_p11 }
  0x21   :  { %284 = shalt.err (!%p281_p1)
}
  0x22   :  { %34 = dma.hbm_to_vmem [thread:$0]  %s382_s1, 1024, %s29_s27, [#allocation6], %s314_s22, %s314_s22, %s315_s23  }
  0x23   :  { %307 = dma.done.wait [#allocation3], 128  }
  0x24   :  { %308 = vsyncadd [#allocation3], 4294967168 }
  0x25   :  { %309 = dma.done.wait [#allocation6], 1024  }
  0x26   :  { %310 = vsyncadd [#allocation6], 4294966272  ;;  %v317_v0 = vmov 0.0   ;;  %vm318_vm0 = vmmov 0   ;;  %v232_v1 = vld [vmem:[#allocation5] sm:$0xff]   ;;  %v233_v2 = vld [vmem:[#allocation5 + $0x8] sm:$0xff]  }
  0x27   :  { %203 = vmatprep.subr.bf16.mxu0 %v317_v0  ;;  %219 = vmatprep.mubr.msk.bf16.mxu0 %vm318_vm0, %v317_v0  ;;  %v234_v3 = vld [vmem:[#allocation5 + $0x10] sm:$0xff]   ;;  %v235_v4 = vld [vmem:[#allocation5 + $0x18] sm:$0xff]   ;;  %v236_v5 = vld [vmem:[#allocation5 + $0x20] sm:$0xff]   ;;  %s319_s11 = smov [#allocation7]  }
  0x28   :  { %204 = vmatpush3.bf16.msra.mxu0 %v232_v1  ;;  %v237_v6 = vld [vmem:[#allocation5 + $0x28] sm:$0xff]   ;;  %v238_v7 = vld [vmem:[#allocation5 + $0x30] sm:$0xff]   ;;  %v239_v8 = vld [vmem:[#allocation5 + $0x38] sm:$0xff]   ;;  %s171_s12 = sshll.u32 %s319_s11, 4  ;;  %s172_s12 = int_to_ptr.vmem [resolvable:$true] %s171_s12 }
  0x29   :  { %205 = vmatprep.subr.bf16.mxu0 %v317_v0  ;;  %v240_v9 = vld [vmem:[#allocation2] sm:$0xff]   ;;  %s285_s13 = scalar_lea.vmem %s172_s12, 256  ;;  %p290_p3 = scmp.lt.s32.totalorder %s172_s12, %s172_s12 }
  0x2a   :  { %v184_v10 = vld [vmem:[%s383_s2] ss:$0 sm:$0xff]  ;;  %p286_p2 = scmp.ne.s32.totalorder %s172_s12, %s285_s13  ;;  %p291_p4 = scmp.lt.s32.totalorder %s285_s13, %s285_s13 }
  0x2c   :  { %206 = vmatpush3.bf16.msra.mxu0 %v233_v2  ;;  %p292_p5 = por %p291_p4, %p290_p3 }
  0x2d   :  { %207 = vmatprep.subr.bf16.mxu0 %v317_v0 }
  0x2e   :  { %p293_p6 = pnand %p292_p5, %p286_p2 }
  0x30   :  { %208 = vmatpush3.bf16.msra.mxu0 %v234_v3 }
  0x31   :  { %209 = vmatprep.subr.bf16.mxu0 %v317_v0 }
  0x34   :  { %210 = vmatpush3.bf16.msra.mxu0 %v235_v4 }
  0x35   :  { %211 = vmatprep.subr.bf16.mxu0 %v317_v0 }
  0x38   :  { %212 = vmatpush3.bf16.msra.mxu0 %v236_v5 }
  0x39   :  { %213 = vmatprep.subr.bf16.mxu0 %v317_v0 }
  0x3c   :  { %214 = vmatpush3.bf16.msra.mxu0 %v237_v6 }
  0x3d   :  { %215 = vmatprep.subr.bf16.mxu0 %v317_v0 }
  0x40   :  { %216 = vmatpush3.bf16.msra.mxu0 %v238_v7 }
  0x41   :  { %217 = vmatprep.subr.bf16.mxu0 %v317_v0 }
  0x44   :  { %218 = vmatpush3.bf16.msra.mxu0 %v239_v8 }
  0x47   :  { %220 = vmatmul.mubr.bf16.vlgmr.msra.gmra.mrb[0].mxu0 %v240_v9 }
 0x11a   :  { %v157_v11 = vpop.f32.mrb[0].mxu0 }
 0x11b   :  { %v158_v12 = vadd.f32 %v184_v10, %v157_v11  ;;  %v221_v13 = vpop.f32.mrb[1].mxu0 }
 0x11c   :  { %v160_v14 = vpop.f32.mrb[2].mxu0 }
 0x11d   :  { %164 = vst [vmem:[#allocation7] sm:$0xff] %v158_v12  ;;  %v161_v15 = vadd.f32 %v184_v10, %v160_v14  ;;  %v222_v16 = vpop.f32.mrb[3].mxu0 }
 0x11f   :  { %165 = vst [vmem:[#allocation7 + $0x8] sm:$0xff] %v161_v15 }
 0x120   :  { %296 = shalt.err (!%p293_p6)
}
 0x121   :  { %s297_s15 = scalar_lea.hbm %s384_s3, 256 }
 0x122   :  { %p298_p7 = scmp.ne.s32.totalorder %s384_s3, %s297_s15  ;;  %p301_p8 = scmp.lt.u32.totalorder %s297_s15, %s384_s3 }
 0x124   :  { %p303_p9 = pnand %p301_p8, %p298_p7 }
 0x126   :  { %306 = shalt.err (!%p303_p9)
}
 0x127   :  { %s320_s20 = smov 128   ;;  %s321_s21 = smov 8  }
 0x128   :  { %177 = dma.vmem_to_hbm [thread:$0]  %s172_s12, 256, %s384_s3, [#allocation4], %s320_s20, %s320_s20, %s321_s21  }
 0x129   :  { %311 = dma.done.wait [#allocation4], 256  }
 0x12a   :  { %312 = vsyncadd [#allocation4], 4294967040 }
 0x12b   :  { %181 = vsyncpa [#allocation3], 1 }
 0x12c   :  { %182 = vsyncpa [#allocation6], 1 }
 0x12d   :  { %183 = vsyncpa [#allocation4], 1 }

</bundles_post_ra>
